<compile_context>
chip_gen: v6e
topology: v6e:2x2x1
jax: 0.10.0
libtpu: 0.0.40
codegen_flags: <defaults>
</compile_context>

<pallas_src>
import functools

import jax
import jax.numpy as jnp
from jax import lax
from jax.experimental import pallas as pl
from jax.experimental.pallas import tpu as pltpu


def _round_up(x, m):
    return (x + m - 1) // m * m


# ----------------------------------------------------------------------------
# Generation-aware VMEM budget
# ----------------------------------------------------------------------------
def _detect_vmem_capacity():
    try:
        info = pltpu.get_tpu_info()
        cap = int(getattr(info, "vmem_capacity_bytes", 0) or 0)
        if cap > 0:
            return cap
    except Exception:
        pass
    return 64 * 1024 * 1024          # conservative fallback (v7x per-TC)


_VMEM_CAPACITY = _detect_vmem_capacity()
# leave headroom below physical capacity; cap well under any hard limit
_VMEM_LIMIT = int(max(32 * 1024 * 1024,
                      min((_VMEM_CAPACITY * 3) // 4, 100 * 1024 * 1024)))


def _pick_tq(T, Bp, Hp):
    """Time-chunk length so the pipelined recurrent blocks fit the VMEM budget."""
    budget = (_VMEM_LIMIT * 3) // 5                       # leave room for compiler scratch
    fixed = 2 * (Hp * 4 * Hp * 2)                         # whh (bf16), double-buffered
    fixed += 2 * (Bp * Hp * 4)                            # h/c f32 scratch
    fixed += 2 * 2 * 2 * (Bp * Hp * 4)                    # hn/cn output blocks
    per_t = 2 * Bp * (4 * Hp * 2 + Hp * 4)                # xg (bf16) + out (f32), 2 buffers
    tq = (budget - fixed) // max(per_t, 1)
    tq = max(8, min(int(tq), 256))
    tq = min(tq, _round_up(T, 8))
    return max(8, (tq // 8) * 8)


# ----------------------------------------------------------------------------
# Pallas kernels
# ----------------------------------------------------------------------------
def _affine_kernel(x_ref, w_ref, b_ref, o_ref, *, use_tanh):
    """One (row, col) tile of  o = (tanh)(x @ w + b)  with bf16 MXU / f32 accum."""
    y = jnp.dot(x_ref[...].astype(jnp.bfloat16), w_ref[...],
                preferred_element_type=jnp.float32) + b_ref[...]
    if use_tanh:
        y = jnp.tanh(y)
    o_ref[...] = y.astype(o_ref.dtype)


def _lstm_rec_kernel(lens_ref, xg_ref, whh_ref, out_ref, hn_ref, cn_ref,
                     h_scr, c_scr, *, tq, hp, unroll):
    """Recurrent part of one LSTM direction over one time chunk.

    Grid = (n_dirs, n_chunks); axis 0 (direction) is parallel, axis 1 is the
    sequential time-chunk axis carrying h/c in VMEM scratch.

    lens_ref: (Bp, 1)       int32 valid lengths per batch row
    xg_ref:   (TQ, Bp, 4Hp) bf16 precomputed x@W_ih^T + b for this direction/chunk
    whh_ref:  (1, Hp, 4Hp)  bf16 recurrent weights for this direction
    out_ref:  (TQ, Bp, Hp)  f32 per-step hidden outputs (zero on padded frames)
    hn_ref/cn_ref: (1, Bp, Hp) final states
    h_scr/c_scr:   (Bp, Hp)    carried f32 state
    Gate packing order is (i, f, o, g): one fused sigmoid over a (Bp, 3Hp) slice.
    """
    d = pl.program_id(0)                      # 0 = forward, 1 = backward
    ci = pl.program_id(1)                     # chunk index for this direction
    nc = pl.num_programs(1)

    @pl.when(ci == 0)
    def _():
        h_scr[...] = jnp.zeros_like(h_scr)
        c_scr[...] = jnp.zeros_like(c_scr)

    # position of this chunk on the (un-reversed) time axis
    tc = ci + d * (nc - 1 - 2 * ci)
    t0 = tc * tq

    bp = h_scr.shape[0]
    # Hoist the length-mask broadcast out of the loop (JAX does not CSE broadcast_in_dim).
    lens_tile = jnp.broadcast_to(lens_ref[...], (bp, hp))
    whh = whh_ref[0]                          # (Hp, 4Hp) bf16, loaded once per chunk

    def step(s, carry):
        s_loc = s + d * (tq - 1 - 2 * s)      # reversed within chunk for bwd
        t = t0 + s_loc                        # global timestep
        h_prev = h_scr[...]
        c_prev = c_scr[...]
        gates = (xg_ref[s_loc].astype(jnp.float32)
                 + jnp.dot(h_prev.astype(jnp.bfloat16), whh,
                           preferred_element_type=jnp.float32))
        # gate slices are lane-aligned because hp % 128 == 0
        sig = jax.nn.sigmoid(gates[:, 0:3 * hp])          # fused (i, f, o)
        i_g = sig[:, 0 * hp:1 * hp]
        f_g = sig[:, 1 * hp:2 * hp]
        o_g = sig[:, 2 * hp:3 * hp]
        g_g = jnp.tanh(gates[:, 3 * hp:4 * hp])
        c_new = f_g * c_prev + i_g * g_g
        h_new = o_g * jnp.tanh(c_new)
        keep = lens_tile > t                  # (Bp, Hp) bool; freezes state past ilens
        c_scr[...] = jnp.where(keep, c_new, c_prev)
        h_scr[...] = jnp.where(keep, h_new, h_prev)
        out_ref[s_loc] = jnp.where(keep, h_new, 0.0)      # padded frames -> exact 0
        return carry

    lax.fori_loop(0, tq, step, 0, unroll=unroll)

    @pl.when(ci == nc - 1)
    def _():
        hn_ref[0] = h_scr[...]
        cn_ref[0] = c_scr[...]


# ----------------------------------------------------------------------------
# Wrappers around pallas_call
# ----------------------------------------------------------------------------
def _affine(x2d, w, b, *, use_tanh, out_dtype=jnp.float32,
            row_tile=512, col_tile=1024):
    """Row/col-tiled (tanh)(x2d @ w + b).  x2d: (rows, K) f32, w: (K, N) bf16, b: (N,) f32."""
    rows, K = x2d.shape
    N = w.shape[1]
    rt = min(row_tile, _round_up(rows, 8))
    tn = min(col_tile, N)
    grid = (pl.cdiv(rows, rt), pl.cdiv(N, tn))
    return pl.pallas_call(
        functools.partial(_affine_kernel, use_tanh=use_tanh),
        grid=grid,
        in_specs=[pl.BlockSpec((rt, K), lambda i, j: (i, 0)),
                  pl.BlockSpec((K, tn), lambda i, j: (0, j)),
                  pl.BlockSpec((1, tn), lambda i, j: (0, j))],
        out_specs=pl.BlockSpec((rt, tn), lambda i, j: (i, j)),
        out_shape=jax.ShapeDtypeStruct((rows, N), out_dtype),
        compiler_params=pltpu.CompilerParams(
            dimension_semantics=("parallel", "parallel"),
            vmem_limit_bytes=_VMEM_LIMIT),
    )(x2d, w, b.reshape(1, N))


def _lstm_layer(xg_both, whh_both, lens_b1, *, n_dirs, hp, tq, unroll):
    """One (bi)directional LSTM layer given precomputed input gates.

    xg_both : (Tp, Bp, n_dirs*4*hp) bf16, columns [d*4hp, (d+1)*4hp) = direction d
    whh_both: (n_dirs, hp, 4*hp)    bf16
    lens_b1 : (Bp, 1) int32
    returns out (Tp, Bp, n_dirs*hp) f32, hn (n_dirs, Bp, hp), cn (n_dirs, Bp, hp)
    """
    Tp, Bp, _ = xg_both.shape
    nc = Tp // tq
    G = 4 * hp

    def chunk_map(d, ci):
        # forward: chunk ci; backward: chunk nc-1-ci; last dim block = direction
        return (ci + d * (nc - 1 - 2 * ci), 0, d)

    kernel = functools.partial(_lstm_rec_kernel, tq=tq, hp=hp, unroll=unroll)
    out, hn, cn = pl.pallas_call(
        kernel,
        grid=(n_dirs, nc),
        in_specs=[
            pl.BlockSpec((Bp, 1), lambda d, ci: (0, 0)),
            pl.BlockSpec((tq, Bp, G), chunk_map),
            pl.BlockSpec((1, hp, G), lambda d, ci: (d, 0, 0)),
        ],
        out_specs=(
            pl.BlockSpec((tq, Bp, hp), chunk_map),
            pl.BlockSpec((1, Bp, hp), lambda d, ci: (d, 0, 0)),
            pl.BlockSpec((1, Bp, hp), lambda d, ci: (d, 0, 0)),
        ),
        out_shape=(
            jax.ShapeDtypeStruct((Tp, Bp, n_dirs * hp), jnp.float32),
            jax.ShapeDtypeStruct((n_dirs, Bp, hp), jnp.float32),
            jax.ShapeDtypeStruct((n_dirs, Bp, hp), jnp.float32),
        ),
        scratch_shapes=[pltpu.VMEM((Bp, hp), jnp.float32),
                        pltpu.VMEM((Bp, hp), jnp.float32)],
        compiler_params=pltpu.CompilerParams(
            dimension_semantics=("parallel", "arbitrary"),
            vmem_limit_bytes=_VMEM_LIMIT),
    )(lens_b1, xg_both, whh_both)
    return out, hn, cn


def rnn_forward(params, x_btd, ilens):
    """Equivalent of RNN.forward(input, ilens) with prev_state=None (eval mode).

    x_btd : (B, T, D) float32, padded batch-first inputs, T == max(ilens),
            ilens sorted descending (pack_padded_sequence requirement).
    Returns (xs_pad (B, T, H), ilens, (h_n, c_n)).
    """
    B, T, _ = x_btd.shape
    H = params["hidden_size"]
    Hp = params["hidden_pad"]
    n_layers = params["n_layers"]
    n_dirs = 2 if params["bidir"] else 1

    Bp = _round_up(B, 8)                  # fill f32 sublanes
    tq = _pick_tq(T, Bp, Hp)              # time-chunk length (VMEM-budgeted)
    Tp = _round_up(T, tq)
    # deeper unroll overlaps step s+1's loads/stores under step s's MXU+EUP chain;
    # shallow at large Hp to avoid vreg spills
    unroll = min(tq, 8 if Hp <= 128 else (4 if Hp <= 512 else 2))

    x_tbd = jnp.transpose(x_btd, (1, 0, 2)).astype(jnp.float32)     # (T, B, D)
    x_tbd = jnp.pad(x_tbd, ((0, Tp - T), (0, Bp - B), (0, 0)))
    lens_b1 = jnp.pad(ilens.astype(jnp.int32), (0, Bp - B)).reshape(Bp, 1)

    layer_in = x_tbd                       # (Tp, Bp, K) f32
    h_list, c_list = [], []
    rows = Tp * Bp
    for l in range(n_layers):
        wih, whh, bias = params["lstm"][l]
        K = layer_in.shape[-1]
        # hoisted input->gates matmul for all timesteps and both directions (bf16 out)
        xg = _affine(layer_in.reshape(rows, K), wih, bias,
                     use_tanh=False, out_dtype=jnp.bfloat16)
        xg = xg.reshape(Tp, Bp, n_dirs * 4 * Hp)
        layer_in, hn, cn = _lstm_layer(xg, whh, lens_b1, n_dirs=n_dirs,
                                       hp=Hp, tq=tq, unroll=unroll)
        h_list.append(hn[:, :B, :H])
        c_list.append(cn[:, :B, :H])

    # final projection tanh(Linear(...)), applied to padded frames too
    proj = _affine(layer_in.reshape(rows, n_dirs * Hp),
                   params["l_last_w"], params["l_last_b"],
                   use_tanh=True, out_dtype=jnp.float32)
    proj = proj.reshape(Tp, Bp, Hp)
    xs_pad = jnp.transpose(proj[:T, :B, :H], (1, 0, 2))             # (B, T, H)

    elayer_states = (jnp.concatenate(h_list, axis=0),
                     jnp.concatenate(c_list, axis=0))
    return xs_pad, ilens, elayer_states


# ----------------------------------------------------------------------------
# Parameter init (PyTorch default U(-1/sqrt(H), 1/sqrt(H))) + padded TPU layout
# ----------------------------------------------------------------------------
_GATE_ORDER = (0, 1, 3, 2)   # repack PyTorch (i, f, g, o) as (i, f, o, g)


def _pack_gate_cols(w_t, H, Hp):
    """(K, 4H) in PyTorch gate order -> (K, 4Hp) in (i,f,o,g) order, gate g at [slot*Hp, slot*Hp+H)."""
    K = w_t.shape[0]
    out = jnp.zeros((K, 4 * Hp), w_t.dtype)
    for slot, g in enumerate(_GATE_ORDER):
        out = out.at[:, slot * Hp:slot * Hp + H].set(w_t[:, g * H:(g + 1) * H])
    return out


def _pack_gate_vec(b, H, Hp):
    out = jnp.zeros((4 * Hp,), b.dtype)
    for slot, g in enumerate(_GATE_ORDER):
        out = out.at[slot * Hp:slot * Hp + H].set(b[g * H:(g + 1) * H])
    return out


def _pack_dir_rows(w, n_dirs, H, Hp):
    """(n_dirs*H, N) -> (n_dirs*Hp, N): direction d's rows placed at [d*Hp, d*Hp+H)."""
    N = w.shape[1]
    out = jnp.zeros((n_dirs * Hp, N), w.dtype)
    for d in range(n_dirs):
        out = out.at[d * Hp:d * Hp + H, :].set(w[d * H:(d + 1) * H, :])
    return out


def init_params(key, input_size, hidden_size, n_layers, bidir=True):
    H = hidden_size
    Hp = _round_up(H, 128)
    n_dirs = 2 if bidir else 1
    k = 1.0 / float(H) ** 0.5

    def unif(key, shape):
        return jax.random.uniform(key, shape, jnp.float32, minval=-k, maxval=k)

    params = {"hidden_size": H, "hidden_pad": Hp, "n_layers": n_layers,
              "bidir": bidir, "lstm": []}
    for l in range(n_layers):
        in_l = input_size if l == 0 else H * n_dirs
        wih_cols, whh_stack, bias_cols = [], [], []
        for _ in range(n_dirs):
            key, k1, k2, k3, k4 = jax.random.split(key, 5)
            w_ih = unif(k1, (4 * H, in_l))          # PyTorch weight_ih_l{l}
            w_hh = unif(k2, (4 * H, H))             # PyTorch weight_hh_l{l}
            b_ih = unif(k3, (4 * H,))
            b_hh = unif(k4, (4 * H,))
            wih_t = _pack_gate_cols(jnp.transpose(w_ih), H, Hp)   # (in_l, 4Hp)
            if l > 0:
                wih_t = _pack_dir_rows(wih_t, n_dirs, H, Hp)      # (n_dirs*Hp, 4Hp)
            whh_t = jnp.pad(_pack_gate_cols(jnp.transpose(w_hh), H, Hp),
                            ((0, Hp - H), (0, 0)))                # (Hp, 4Hp)
            wih_cols.append(wih_t)
            whh_stack.append(whh_t)
            bias_cols.append(_pack_gate_vec(b_ih + b_hh, H, Hp))
        params["lstm"].append((
            jnp.concatenate(wih_cols, axis=1).astype(jnp.bfloat16),   # (K, n_dirs*4Hp) bf16
            jnp.stack(whh_stack, axis=0).astype(jnp.bfloat16),        # (n_dirs, Hp, 4Hp) bf16
            jnp.concatenate(bias_cols, axis=0),                        # (n_dirs*4Hp,) f32
        ))

    key, k1, k2 = jax.random.split(key, 3)
    kl = 1.0 / float(H * n_dirs) ** 0.5
    l_w = jax.random.uniform(k1, (H, H * n_dirs), jnp.float32, -kl, kl)
    l_b = jax.random.uniform(k2, (H,), jnp.float32, -kl, kl)
    w_t = _pack_dir_rows(jnp.transpose(l_w), n_dirs, H, Hp)            # (n_dirs*Hp, H)
    params["l_last_w"] = jnp.pad(w_t, ((0, 0), (0, Hp - H))).astype(jnp.bfloat16)  # (n_dirs*Hp, Hp)
    params["l_last_b"] = jnp.pad(l_b, (0, Hp - H))                     # (Hp,) f32
    return params


# ----------------------------------------------------------------------------
if __name__ == "__main__":
    key = jax.random.PRNGKey(0)
    B, T, D_IN, H, N_LAYERS = 2, 8, 16, 32, 2

    kx, kp = jax.random.split(key)
    x = jax.random.normal(kx, (B, T, D_IN), dtype=jnp.float32)
    # pack_padded_sequence requires lengths sorted descending; T == max(ilens)
    ilens = jnp.array([8, 6], dtype=jnp.int32)

    params = init_params(kp, D_IN, H, N_LAYERS, bidir=True)   # typ='blstm'

    xs_pad, olens, elayer_states = rnn_forward(params, x, ilens)
    jax.block_until_ready(xs_pad)
    jax.block_until_ready(elayer_states)

    assert xs_pad.shape == (B, T, H)
    assert elayer_states[0].shape == (N_LAYERS * 2, B, H)
    assert elayer_states[1].shape == (N_LAYERS * 2, B, H)
    print("KERNEL_OK")
</pallas_src>

<mosaic_0001>
module attributes {stable_mosaic.version = 11 : i64} {
  func.func @_affine_kernel(%arg0: i32, %arg1: i32, %arg2: memref<64x16xf32, #tpu.memory_space<vmem>>, %arg3: memref<16x1024xbf16, #tpu.memory_space<vmem>>, %arg4: memref<1x1024xf32, #tpu.memory_space<vmem>>, %arg5: memref<64x1024xbf16, #tpu.memory_space<vmem>>) attributes {dimension_semantics = [#tpu.dimension_semantics<parallel>, #tpu.dimension_semantics<parallel>], iteration_bounds = array<i64: 1, 1>, scalar_prefetch = 0 : i64, scratch_operands = 0 : i64, tpu.core_type = #tpu.core_type<tc>, window_params = [{transform_indices = @transform_0, window_bounds = array<i64: 64, 16>}, {transform_indices = @transform_1, window_bounds = array<i64: 16, 1024>}, {transform_indices = @transform_2, window_bounds = array<i64: 1, 1024>}, {transform_indices = @transform_3, window_bounds = array<i64: 64, 1024>}]} {
    %c0 = arith.constant 0 : index
    %c0_0 = arith.constant 0 : index
    %0 = vector.load %arg2[%c0, %c0_0] : memref<64x16xf32, #tpu.memory_space<vmem>>, vector<64x16xf32>
    %1 = arith.truncf %0 : vector<64x16xf32> to vector<64x16xbf16>
    %c0_1 = arith.constant 0 : index
    %c0_2 = arith.constant 0 : index
    %2 = vector.load %arg3[%c0_1, %c0_2] : memref<16x1024xbf16, #tpu.memory_space<vmem>>, vector<16x1024xbf16>
    %cst = arith.constant dense<0.000000e+00> : vector<64x1024xf32>
    %3 = tpu.matmul %1, %2, %cst {dimension_numbers = #tpu.dot_dimension_numbers<[1], [0], [0], [1], [0, 0, 1, 1], [], []>} : vector<64x16xbf16>, vector<16x1024xbf16>, vector<64x1024xf32> -> vector<64x1024xf32>
    %c0_3 = arith.constant 0 : index
    %c0_4 = arith.constant 0 : index
    %4 = vector.load %arg4[%c0_3, %c0_4] : memref<1x1024xf32, #tpu.memory_space<vmem>>, vector<1x1024xf32>
    %5 = vector.broadcast %4 : vector<1x1024xf32> to vector<64x1024xf32>
    %6 = arith.addf %3, %5 : vector<64x1024xf32>
    %7 = arith.truncf %6 : vector<64x1024xf32> to vector<64x1024xbf16>
    %c0_5 = arith.constant 0 : index
    %c0_6 = arith.constant 0 : index
    %8 = vector.load %arg5[%c0_5, %c0_6] : memref<64x1024xbf16, #tpu.memory_space<vmem>>, vector<64x1024xbf16>
    tpu.vector_store %arg5[%c0_5, %c0_6], %7 {strides = array<i32>} : memref<64x1024xbf16, #tpu.memory_space<vmem>>, vector<64x1024xbf16>,
    return
  }
  func.func @transform_0(%arg0: i32, %arg1: i32) -> (i32, i32) {
    %c0_i32 = arith.constant 0 : i32
    %c0_i32_0 = arith.constant 0 : i32
    return %arg0, %c0_i32 : i32, i32
  }
  func.func @transform_1(%arg0: i32, %arg1: i32) -> (i32, i32) {
    %c0_i32 = arith.constant 0 : i32
    %c0_i32_0 = arith.constant 0 : i32
    return %c0_i32, %arg1 : i32, i32
  }
  func.func @transform_2(%arg0: i32, %arg1: i32) -> (i32, i32) {
    %c0_i32 = arith.constant 0 : i32
    %c0_i32_0 = arith.constant 0 : i32
    return %c0_i32, %arg1 : i32, i32
  }
  func.func @transform_3(%arg0: i32, %arg1: i32) -> (i32, i32) {
    %c0_i32 = arith.constant 0 : i32
    return %arg0, %arg1 : i32, i32
  }
}

</mosaic_0001>

<bundles_post_ra>
// kernel: tpu_custom_call.1
= control target key start
LH: loop header
LB: loop body
LE: loop exit
PB: predicated region body
PF: predicated region fallthrough
CT: control target
= control target key end

     0   :  { %v777_v6 = vmov 0   ;;  %vm118_vm0 = vcmask 130048   ;;  %s971_s0 = inlined_call_operand.vmem [shape: f32[64,16], index: 0, kind: input, shape index: {}]   ;;  %s972_s1 = inlined_call_operand.vmem [shape: bf16[16,1024], index: 1, kind: input, shape index: {}]   ;;  %s973_s2 = inlined_call_operand.vmem [shape: f32[1,1024], index: 2, kind: input, shape index: {}]   ;;  %s974_s3 = inlined_call_operand.hbm [shape: bf16[64,1024], index: 3, kind: output, shape index: {}]  }
   0x1   :  { %v28_v0 = vld [vmem:[%s972_s1] sm:$0xff]  ;;  %v29_v2 = vld [vmem:[%s972_s1 + $0x8] sm:$0xff]  ;;  %163 = vmatprep.mubr.bf16.mxu0 %v777_v6  ;;  %236 = vmatprep.mubr.bf16.mxu1 %v777_v6  ;;  %v30_v11 = vld [vmem:[%s972_s1 + $0x10] sm:$0xff] }
   0x2   :  { %v32_v1 = vld [vmem:[%s972_s1 + $0x20] sm:$0xff]  ;;  %v33_v4 = vld [vmem:[%s972_s1 + $0x28] sm:$0xff]  ;;  %v34_v12 = vld [vmem:[%s972_s1 + $0x30] sm:$0xff] }
   0x3   :  { %v664_v3 = vcombine.high %v28_v0, %v32_v1  ;;  %v663_v5 = vcombine.low %v28_v0, %v32_v1  ;;  %v16_v7 = vld [vmem:[%s971_s0] sm:$0xff]  ;;  %v17_v8 = vld [vmem:[%s971_s0 + $0x8] sm:$0xff]  ;;  %v666_v9 = vcombine.high %v29_v2, %v33_v4  ;;  %v665_v10 = vcombine.low %v29_v2, %v33_v4  ;;  %v31_v13 = vld [vmem:[%s972_s1 + $0x18] sm:$0xff] }
   0x4   :  { %v24_v14 = vpack.c.bf16 %v17_v8, %v16_v7  ;;  %v668_v15 = vcombine.high %v30_v11, %v34_v12  ;;  %v35_v16 = vld [vmem:[%s972_s1 + $0x38] sm:$0xff]  ;;  %v667_v17 = vcombine.low %v30_v11, %v34_v12 }
   0x5   :  { %145 = vmatprep.subr.bf16.mxu0 %v664_v3  ;;  %218 = vmatprep.subr.bf16.mxu1 %v666_v9  ;;  %v670_v18 = vcombine.high %v31_v13, %v35_v16  ;;  %v669_v19 = vcombine.low %v31_v13, %v35_v16 }
   0x6   :  { %146 = vmatpush1.bf16.msra.mxu0 %v663_v5  ;;  %219 = vmatpush1.bf16.msra.mxu1 %v665_v10 }
   0x7   :  { %291 = vmatprep.subr.bf16.mxu0 %v668_v15 }
   0x8   :  { %8 = vsyncpa [#allocation3], 0  ;;  %364 = vmatprep.subr.bf16.mxu1 %v670_v18  ;;  %v18_v20 = vld [vmem:[%s971_s0 + $0x10] sm:$0xff]  ;;  %v19_v21 = vld [vmem:[%s971_s0 + $0x18] sm:$0xff]  ;;  %v38_v29 = vlaneseq }
   0x9   :  { %671 = vmatmul.mubr.msk.bf16.vlgmr.msra.gmra.mxu0 %vm118_vm0, %v24_v14  ;;  %675 = vmatmul.mubr.msk.bf16.vlgmr.msra.gmra.mxu1 %vm118_vm0, %v24_v14  ;;  %v25_v22 = vpack.c.bf16 %v19_v21, %v18_v20  ;;  %v20_v23 = vld [vmem:[%s971_s0 + $0x20] sm:$0xff]  ;;  %v21_v24 = vld [vmem:[%s971_s0 + $0x28] sm:$0xff]  ;;  %v22_v26 = vld [vmem:[%s971_s0 + $0x30] sm:$0xff] }
   0xa   :  { %292 = vmatpush1.bf16.msra.mxu0 %v667_v17  ;;  %365 = vmatpush1.bf16.msra.mxu1 %v669_v19  ;;  %v26_v25 = vpack.c.bf16 %v21_v24, %v20_v23  ;;  %v23_v27 = vld [vmem:[%s971_s0 + $0x38] sm:$0xff]  ;;  %v865_v30 = vshrl.u32 %v38_v29, 7  ;;  %v872_v33 = vld [vmem:[%s973_s2] sm:$0xff]  ;;  %s778_s2 = smov [#allocation2]  }
   0xb   :  { %173 = vmatprep.mubr.bf16.mxu0 %v777_v6  ;;  %246 = vmatprep.mubr.bf16.mxu1 %v777_v6  ;;  %v27_v28 = vpack.c.bf16 %v23_v27, %v22_v26  ;;  %s652_s17 = sshll.u32 %s778_s2, 4  ;;  %s653_s17 = int_to_ptr.vmem [resolvable:$true] %s652_s17 }
   0xc   :  { %v40_v31 = vsub.s32 0, %v865_v30  ;;  %v44_v32 = vsub.s32 1, %v865_v30  ;;  %v48_v34 = vsub.s32 2, %v865_v30  ;;  %v52_v35 = vsub.s32 3, %v865_v30  ;;  %s755_s18 = scalar_lea.vmem %s653_s17, 4096  ;;  %p760_p1 = scmp.lt.s32.totalorder %s653_s17, %s653_s17 }
   0xd   :  { %p756_p0 = scmp.ne.s32.totalorder %s653_s17, %s755_s18  ;;  %p761_p2 = scmp.lt.s32.totalorder %s755_s18, %s755_s18 }
   0xe   :  { %v877_v36 = vrot.slane %v872_v33, %v40_v31  ;;  %v880_v37 = vrot.slane %v872_v33, %v44_v32  ;;  %v883_v39 = vrot.slane %v872_v33, %v48_v34  ;;  %v886_v40 = vrot.slane %v872_v33, %v52_v35 }
   0xf   :  { %p762_p3 = por %p761_p2, %p760_p1 }
  0x11   :  { %672 = vmatmul.mubr.msk.bf16.gmra.mxu0 %vm118_vm0, %v25_v22  ;;  %676 = vmatmul.mubr.msk.bf16.gmra.mxu1 %vm118_vm0, %v25_v22  ;;  %p763_p4 = pnand %p762_p3, %p756_p0 }
  0x12   :  { %183 = vmatprep.mubr.bf16.mxu0 %v777_v6  ;;  %256 = vmatprep.mubr.bf16.mxu1 %v777_v6 }
  0x19   :  { %673 = vmatmul.mubr.msk.bf16.gmra.mxu0 %vm118_vm0, %v26_v25  ;;  %677 = vmatmul.mubr.msk.bf16.gmra.mxu1 %vm118_vm0, %v26_v25 }
  0x1a   :  { %193 = vmatprep.mubr.bf16.mxu0 %v777_v6  ;;  %266 = vmatprep.mubr.bf16.mxu1 %v777_v6 }
  0x21   :  { %674 = vmatmul.mubr.msk.bf16.gmra.mxu0 %vm118_vm0, %v27_v28  ;;  %678 = vmatmul.mubr.msk.bf16.gmra.mxu1 %vm118_vm0, %v27_v28 }
  0x22   :  { %309 = vmatprep.mubr.bf16.mxu0 %v777_v6  ;;  %382 = vmatprep.mubr.bf16.mxu1 %v777_v6 }
  0x29   :  { %679 = vmatmul.mubr.msk.bf16.vlgmr.msra.gmra.mxu0 %vm118_vm0, %v24_v14  ;;  %683 = vmatmul.mubr.msk.bf16.vlgmr.msra.gmra.mxu1 %vm118_vm0, %v24_v14 }
  0x2a   :  { %319 = vmatprep.mubr.bf16.mxu0 %v777_v6  ;;  %392 = vmatprep.mubr.bf16.mxu1 %v777_v6 }
  0x31   :  { %680 = vmatmul.mubr.msk.bf16.gmra.mxu0 %vm118_vm0, %v25_v22  ;;  %684 = vmatmul.mubr.msk.bf16.gmra.mxu1 %vm118_vm0, %v25_v22 }
  0x32   :  { %329 = vmatprep.mubr.bf16.mxu0 %v777_v6  ;;  %402 = vmatprep.mubr.bf16.mxu1 %v777_v6 }
  0x39   :  { %681 = vmatmul.mubr.msk.bf16.gmra.mxu0 %vm118_vm0, %v26_v25  ;;  %685 = vmatmul.mubr.msk.bf16.gmra.mxu1 %vm118_vm0, %v26_v25 }
  0x3a   :  { %339 = vmatprep.mubr.bf16.mxu0 %v777_v6  ;;  %412 = vmatprep.mubr.bf16.mxu1 %v777_v6 }
  0x41   :  { %682 = vmatmul.mubr.msk.bf16.gmra.mxu0 %vm118_vm0, %v27_v28  ;;  %686 = vmatmul.mubr.msk.bf16.gmra.mxu1 %vm118_vm0, %v27_v28 }
  0xc9   :  { %v165_v38 = vpop.f32.mrf.mxu0  ;;  %v238_v41 = vpop.f32.mrf.mxu1 }
  0xca   :  { %v166_v43 = vadd.f32 %v165_v38, %v877_v36  ;;  %v239_v46 = vadd.f32 %v238_v41, %v883_v39 }
  0xcb   :  { %v167_v42 = vpop.f32.mrf.mxu0  ;;  %v240_v45 = vpop.f32.mrf.mxu1 }
  0xcc   :  { %v168_v44 = vadd.f32 %v167_v42, %v880_v37  ;;  %v241_v47 = vadd.f32 %v240_v45, %v886_v40 }
  0xcd   :  { %v169_v48 = vpop.f32.mrf.mxu0  ;;  %v242_v50 = vpop.f32.mrf.mxu1 }
  0xce   :  { %v719_v49 = vpack.c.bf16 %v168_v44, %v166_v43  ;;  %v720_v51 = vpack.c.bf16 %v241_v47, %v239_v46  ;;  %v170_v53 = vadd.f32 %v169_v48, %v877_v36  ;;  %v243_v56 = vadd.f32 %v242_v50, %v883_v39 }
  0xcf   :  { %v171_v52 = vpop.f32.mrf.mxu0  ;;  %v244_v55 = vpop.f32.mrf.mxu1  ;;  %v56_v48 = vsub.s32 4, %v865_v30 }
  0xd0   :  { %615 = vst [vmem:[#allocation2] sm:$0xff] %v719_v49  ;;  %v172_v54 = vadd.f32 %v171_v52, %v880_v37  ;;  %616 = vst [vmem:[#allocation2 + $0x8] sm:$0xff] %v720_v51  ;;  %v245_v57 = vadd.f32 %v244_v55, %v886_v40  ;;  %v60_v49 = vsub.s32 5, %v865_v30 }
  0xd1   :  { %v175_v58 = vpop.f32.mrf.mxu0  ;;  %v248_v60 = vpop.f32.mrf.mxu1 }
  0xd2   :  { %v723_v59 = vpack.c.bf16 %v172_v54, %v170_v53  ;;  %v724_v61 = vpack.c.bf16 %v245_v57, %v243_v56  ;;  %v176_v63 = vadd.f32 %v175_v58, %v877_v36  ;;  %v249_v2 = vadd.f32 %v248_v60, %v883_v39 }
  0xd3   :  { %v177_v62 = vpop.f32.mrf.mxu0  ;;  %v250_v1 = vpop.f32.mrf.mxu1  ;;  %v64_v53 = vsub.s32 6, %v865_v30  ;;  %v68_v54 = vsub.s32 7, %v865_v30 }
  0xd4   :  { %619 = vst [vmem:[#allocation2 + $0x20] sm:$0xff] %v723_v59  ;;  %v178_v0 = vadd.f32 %v177_v62, %v880_v37  ;;  %620 = vst [vmem:[#allocation2 + $0x28] sm:$0xff] %v724_v61  ;;  %v251_v3 = vadd.f32 %v250_v1, %v886_v40  ;;  %v923_v62 = vrot.slane %v872_v33, %v56_v48 }
  0xd5   :  { %v179_v4 = vpop.f32.mrf.mxu0  ;;  %v252_v6 = vpop.f32.mrf.mxu1 }
  0xd6   :  { %v727_v5 = vpack.c.bf16 %v178_v0, %v176_v63  ;;  %v728_v7 = vpack.c.bf16 %v251_v3, %v249_v2  ;;  %v180_v9 = vadd.f32 %v179_v4, %v877_v36  ;;  %v253_v12 = vadd.f32 %v252_v6, %v883_v39 }
  0xd7   :  { %v181_v8 = vpop.f32.mrf.mxu0  ;;  %v254_v11 = vpop.f32.mrf.mxu1  ;;  %v926_v63 = vrot.slane %v872_v33, %v60_v49  ;;  %v931_v2 = vrot.slane %v872_v33, %v64_v53 }
  0xd8   :  { %623 = vst [vmem:[#allocation2 + $0x40] sm:$0xff] %v727_v5  ;;  %v182_v10 = vadd.f32 %v181_v8, %v880_v37  ;;  %624 = vst [vmem:[#allocation2 + $0x48] sm:$0xff] %v728_v7  ;;  %v255_v13 = vadd.f32 %v254_v11, %v886_v40 }
  0xd9   :  { %v185_v14 = vpop.f32.mrf.mxu0  ;;  %v258_v16 = vpop.f32.mrf.mxu1 }
  0xda   :  { %v731_v15 = vpack.c.bf16 %v182_v10, %v180_v9  ;;  %v732_v17 = vpack.c.bf16 %v255_v13, %v253_v12  ;;  %v186_v19 = vadd.f32 %v185_v14, %v877_v36  ;;  %v259_v22 = vadd.f32 %v258_v16, %v883_v39 }
  0xdb   :  { %v187_v18 = vpop.f32.mrf.mxu0  ;;  %v260_v21 = vpop.f32.mrf.mxu1 }
  0xdc   :  { %627 = vst [vmem:[#allocation2 + $0x60] sm:$0xff] %v731_v15  ;;  %v188_v20 = vadd.f32 %v187_v18, %v880_v37  ;;  %628 = vst [vmem:[#allocation2 + $0x68] sm:$0xff] %v732_v17  ;;  %v261_v23 = vadd.f32 %v260_v21, %v886_v40 }
  0xdd   :  { %v189_v24 = vpop.f32.mrf.mxu0  ;;  %v262_v26 = vpop.f32.mrf.mxu1 }
  0xde   :  { %v735_v25 = vpack.c.bf16 %v188_v20, %v186_v19  ;;  %v736_v27 = vpack.c.bf16 %v261_v23, %v259_v22  ;;  %v190_v29 = vadd.f32 %v189_v24, %v877_v36  ;;  %v263_v34 = vadd.f32 %v262_v26, %v883_v39 }
  0xdf   :  { %v191_v28 = vpop.f32.mrf.mxu0  ;;  %v264_v32 = vpop.f32.mrf.mxu1 }
  0xe0   :  { %631 = vst [vmem:[#allocation2 + $0x80] sm:$0xff] %v735_v25  ;;  %v192_v31 = vadd.f32 %v191_v28, %v880_v37  ;;  %632 = vst [vmem:[#allocation2 + $0x88] sm:$0xff] %v736_v27  ;;  %v265_v35 = vadd.f32 %v264_v32, %v886_v40 }
  0xe1   :  { %v195_v38 = vpop.f32.mrf.mxu0  ;;  %v268_v42 = vpop.f32.mrf.mxu1 }
  0xe2   :  { %v739_v41 = vpack.c.bf16 %v192_v31, %v190_v29  ;;  %v740_v43 = vpack.c.bf16 %v265_v35, %v263_v34  ;;  %v196_v45 = vadd.f32 %v195_v38, %v877_v36  ;;  %v269_v50 = vadd.f32 %v268_v42, %v883_v39 }
  0xe3   :  { %v197_v44 = vpop.f32.mrf.mxu0  ;;  %v270_v47 = vpop.f32.mrf.mxu1 }
  0xe4   :  { %635 = vst [vmem:[#allocation2 + $0xa0] sm:$0xff] %v739_v41  ;;  %v198_v46 = vadd.f32 %v197_v44, %v880_v37  ;;  %636 = vst [vmem:[#allocation2 + $0xa8] sm:$0xff] %v740_v43  ;;  %v271_v51 = vadd.f32 %v270_v47, %v886_v40 }
  0xe5   :  { %v199_v52 = vpop.f32.mrf.mxu0  ;;  %v272_v56 = vpop.f32.mrf.mxu1 }
  0xe6   :  { %v743_v55 = vpack.c.bf16 %v198_v46, %v196_v45  ;;  %v744_v57 = vpack.c.bf16 %v271_v51, %v269_v50  ;;  %v200_v59 = vadd.f32 %v199_v52, %v877_v36  ;;  %v273_v0 = vadd.f32 %v272_v56, %v883_v39 }
  0xe7   :  { %v201_v58 = vpop.f32.mrf.mxu0  ;;  %v274_v61 = vpop.f32.mrf.mxu1  ;;  %v934_v36 = vrot.slane %v872_v33, %v68_v54 }
  0xe8   :  { %639 = vst [vmem:[#allocation2 + $0xc0] sm:$0xff] %v743_v55  ;;  %v202_v60 = vadd.f32 %v201_v58, %v880_v37  ;;  %640 = vst [vmem:[#allocation2 + $0xc8] sm:$0xff] %v744_v57  ;;  %v275_v30 = vadd.f32 %v274_v61, %v886_v40 }
  0xe9   :  { %v311_v1 = vpop.f32.mrf.mxu0  ;;  %v384_v3 = vpop.f32.mrf.mxu1 }
  0xea   :  { %v747_v37 = vpack.c.bf16 %v202_v60, %v200_v59  ;;  %v748_v4 = vpack.c.bf16 %v275_v30, %v273_v0  ;;  %v312_v6 = vadd.f32 %v311_v1, %v923_v62  ;;  %v385_v39 = vadd.f32 %v384_v3, %v931_v2 }
  0xeb   :  { %v313_v5 = vpop.f32.mrf.mxu0  ;;  %v386_v8 = vpop.f32.mrf.mxu1 }
  0xec   :  { %643 = vst [vmem:[#allocation2 + $0xe0] sm:$0xff] %v747_v37  ;;  %v314_v7 = vadd.f32 %v313_v5, %v926_v63  ;;  %644 = vst [vmem:[#allocation2 + $0xe8] sm:$0xff] %v748_v4  ;;  %v387_v40 = vadd.f32 %v386_v8, %v934_v36 }
  0xed   :  { %v315_v9 = vpop.f32.mrf.mxu0  ;;  %v388_v11 = vpop.f32.mrf.mxu1 }
  0xee   :  { %v721_v10 = vpack.c.bf16 %v314_v7, %v312_v6  ;;  %v722_v33 = vpack.c.bf16 %v387_v40, %v385_v39  ;;  %v316_v13 = vadd.f32 %v315_v9, %v923_v62  ;;  %v389_v16 = vadd.f32 %v388_v11, %v931_v2 }
  0xef   :  { %v317_v12 = vpop.f32.mrf.mxu0  ;;  %v390_v15 = vpop.f32.mrf.mxu1 }
  0xf0   :  { %617 = vst [vmem:[#allocation2 + $0x10] sm:$0xff] %v721_v10  ;;  %v318_v14 = vadd.f32 %v317_v12, %v926_v63  ;;  %618 = vst [vmem:[#allocation2 + $0x18] sm:$0xff] %v722_v33  ;;  %v391_v17 = vadd.f32 %v390_v15, %v934_v36 }
  0xf1   :  { %v321_v18 = vpop.f32.mrf.mxu0  ;;  %v394_v20 = vpop.f32.mrf.mxu1 }
  0xf2   :  { %v725_v19 = vpack.c.bf16 %v318_v14, %v316_v13  ;;  %v726_v21 = vpack.c.bf16 %v391_v17, %v389_v16  ;;  %v322_v23 = vadd.f32 %v321_v18, %v923_v62  ;;  %v395_v26 = vadd.f32 %v394_v20, %v931_v2 }
  0xf3   :  { %v323_v22 = vpop.f32.mrf.mxu0  ;;  %v396_v25 = vpop.f32.mrf.mxu1 }
  0xf4   :  { %621 = vst [vmem:[#allocation2 + $0x30] sm:$0xff] %v725_v19  ;;  %v324_v24 = vadd.f32 %v323_v22, %v926_v63  ;;  %622 = vst [vmem:[#allocation2 + $0x38] sm:$0xff] %v726_v21  ;;  %v397_v27 = vadd.f32 %v396_v25, %v934_v36 }
  0xf5   :  { %v325_v28 = vpop.f32.mrf.mxu0  ;;  %v398_v31 = vpop.f32.mrf.mxu1 }
  0xf6   :  { %v729_v29 = vpack.c.bf16 %v324_v24, %v322_v23  ;;  %v730_v32 = vpack.c.bf16 %v397_v27, %v395_v26  ;;  %v326_v35 = vadd.f32 %v325_v28, %v923_v62  ;;  %v399_v42 = vadd.f32 %v398_v31, %v931_v2 }
  0xf7   :  { %v327_v34 = vpop.f32.mrf.mxu0  ;;  %v400_v41 = vpop.f32.mrf.mxu1 }
  0xf8   :  { %625 = vst [vmem:[#allocation2 + $0x50] sm:$0xff] %v729_v29  ;;  %v328_v38 = vadd.f32 %v327_v34, %v926_v63  ;;  %626 = vst [vmem:[#allocation2 + $0x58] sm:$0xff] %v730_v32  ;;  %v401_v43 = vadd.f32 %v400_v41, %v934_v36 }
  0xf9   :  { %v331_v44 = vpop.f32.mrf.mxu0  ;;  %v404_v46 = vpop.f32.mrf.mxu1 }
  0xfa   :  { %v733_v45 = vpack.c.bf16 %v328_v38, %v326_v35  ;;  %v734_v47 = vpack.c.bf16 %v401_v43, %v399_v42  ;;  %v332_v49 = vadd.f32 %v331_v44, %v923_v62  ;;  %v405_v52 = vadd.f32 %v404_v46, %v931_v2 }
  0xfb   :  { %v333_v48 = vpop.f32.mrf.mxu0  ;;  %v406_v51 = vpop.f32.mrf.mxu1 }
  0xfc   :  { %629 = vst [vmem:[#allocation2 + $0x70] sm:$0xff] %v733_v45  ;;  %v334_v50 = vadd.f32 %v333_v48, %v926_v63  ;;  %630 = vst [vmem:[#allocation2 + $0x78] sm:$0xff] %v734_v47  ;;  %v407_v53 = vadd.f32 %v406_v51, %v934_v36 }
  0xfd   :  { %v335_v54 = vpop.f32.mrf.mxu0  ;;  %v408_v56 = vpop.f32.mrf.mxu1 }
  0xfe   :  { %v737_v55 = vpack.c.bf16 %v334_v50, %v332_v49  ;;  %v738_v57 = vpack.c.bf16 %v407_v53, %v405_v52  ;;  %v336_v59 = vadd.f32 %v335_v54, %v923_v62  ;;  %v409_v0 = vadd.f32 %v408_v56, %v931_v2 }
  0xff   :  { %v337_v58 = vpop.f32.mrf.mxu0  ;;  %v410_v61 = vpop.f32.mrf.mxu1 }
 0x100   :  { %633 = vst [vmem:[#allocation2 + $0x90] sm:$0xff] %v737_v55  ;;  %v338_v60 = vadd.f32 %v337_v58, %v926_v63  ;;  %634 = vst [vmem:[#allocation2 + $0x98] sm:$0xff] %v738_v57  ;;  %v411_v30 = vadd.f32 %v410_v61, %v934_v36 }
 0x101   :  { %v341_v1 = vpop.f32.mrf.mxu0  ;;  %v414_v3 = vpop.f32.mrf.mxu1 }
 0x102   :  { %v741_v37 = vpack.c.bf16 %v338_v60, %v336_v59  ;;  %v742_v4 = vpack.c.bf16 %v411_v30, %v409_v0  ;;  %v342_v6 = vadd.f32 %v341_v1, %v923_v62  ;;  %v415_v39 = vadd.f32 %v414_v3, %v931_v2 }
 0x103   :  { %v343_v5 = vpop.f32.mrf.mxu0  ;;  %v416_v8 = vpop.f32.mrf.mxu1 }
 0x104   :  { %637 = vst [vmem:[#allocation2 + $0xb0] sm:$0xff] %v741_v37  ;;  %v344_v7 = vadd.f32 %v343_v5, %v926_v63  ;;  %638 = vst [vmem:[#allocation2 + $0xb8] sm:$0xff] %v742_v4  ;;  %v417_v40 = vadd.f32 %v416_v8, %v934_v36 }
 0x105   :  { %v345_v9 = vpop.f32.mrf.mxu0  ;;  %v418_v11 = vpop.f32.mrf.mxu1 }
 0x106   :  { %v745_v10 = vpack.c.bf16 %v344_v7, %v342_v6  ;;  %v746_v33 = vpack.c.bf16 %v417_v40, %v415_v39  ;;  %v346_v13 = vadd.f32 %v345_v9, %v923_v62  ;;  %v419_v16 = vadd.f32 %v418_v11, %v931_v2 }
 0x107   :  { %v347_v12 = vpop.f32.mrf.mxu0  ;;  %v420_v15 = vpop.f32.mrf.mxu1 }
 0x108   :  { %641 = vst [vmem:[#allocation2 + $0xd0] sm:$0xff] %v745_v10  ;;  %v348_v14 = vadd.f32 %v347_v12, %v926_v63  ;;  %642 = vst [vmem:[#allocation2 + $0xd8] sm:$0xff] %v746_v33  ;;  %v421_v17 = vadd.f32 %v420_v15, %v934_v36 }
 0x10a   :  { %v749_v18 = vpack.c.bf16 %v348_v14, %v346_v13  ;;  %v750_v19 = vpack.c.bf16 %v421_v17, %v419_v16 }
 0x10c   :  { %645 = vst [vmem:[#allocation2 + $0xf0] sm:$0xff] %v749_v18  ;;  %646 = vst [vmem:[#allocation2 + $0xf8] sm:$0xff] %v750_v19 }
 0x10d   :  { %766 = shalt.err (!%p763_p4)
}
 0x10e   :  { %s779_s19 = smov 512   ;;  %s780_s20 = smov 32  }
 0x10f   :  { %658 = dma.vmem_to_hbm [thread:$0]  %s653_s17, 4096, %s974_s3, [#allocation3], %s779_s19, %s779_s19, %s780_s20  }
 0x110   :  { %775 = dma.done.wait [#allocation3], 4096  }
 0x111   :  { %776 = vsyncadd [#allocation3], 4294963200 }
 0x112   :  { %662 = vsyncpa [#allocation3], 1 }

</bundles_post_ra>
